<compile_context>
chip_gen: v5e
topology: v5e:2x2
jax: 0.10.0
libtpu: 0.0.40
codegen_flags: <defaults>
</compile_context>

<pallas_src>
import jax
import jax.numpy as jnp
from jax.experimental import pallas as pl
from jax.experimental.pallas import tpu as pltpu

# LPIPS constants (C == 3).
_SHIFT = (-0.030, -0.088, -0.188)
_SCALE = (0.458, 0.448, 0.450)
_INV_SCALE = tuple(1.0 / s for s in _SCALE)

_LANE = 128


def _scaling_kernel(x_ref, o_ref):
    block_rows = x_ref.shape[0]
    # channel = (global row) % 3.  Built in-kernel (cheap VALU/scalar work) so
    # there are no side inputs -> no extra DMA streams in the pipeline.
    row0 = pl.program_id(0) * block_rows
    ch = (row0 + jax.lax.broadcasted_iota(jnp.int32, (block_rows, 1), 0)) % 3
    shift = jnp.where(ch == 0, _SHIFT[0],
                      jnp.where(ch == 1, _SHIFT[1], _SHIFT[2]))
    inv_scale = jnp.where(ch == 0, _INV_SCALE[0],
                          jnp.where(ch == 1, _INV_SCALE[1], _INV_SCALE[2]))
    x = x_ref[...]
    o_ref[...] = (x - shift.astype(x.dtype)) * inv_scale.astype(x.dtype)


def _round_up(v: int, m: int) -> int:
    return ((v + m - 1) // m) * m


def _sublane(itemsize: int) -> int:
    # 8 sublanes for 32-bit, 16 for bf16, 32 for int8 — keeps row blocks
    # divisible by the (8, 128) tiling rule for every supported dtype.
    return max(8, 32 // max(itemsize, 1))


def _budgets():
    """(per_pipeline_buffer_bytes, vmem_limit_bytes), generation-aware."""
    kind = ""
    try:
        kind = jax.devices()[0].device_kind.lower()
    except Exception:
        pass
    if "v7" in kind:
        # v7x: only 64 MiB physical VMEM per core — stay inside the 32 MiB
        # scoped default.  4 MiB/buffer * (2 in + 2 out) = 16 MiB footprint.
        return 4 << 20, 32 << 20
    # v5e / v6e: 128 MiB physical VMEM; give the pipeline more headroom.
    return 6 << 20, 48 << 20


def _choose_tiles(rows: int, hw_padded: int, itemsize: int, per_buf: int):
    """Pick (block_rows, tile_hw).  Prefers full-lane (contiguous-DMA) blocks."""
    sub = _sublane(itemsize)
    row_bytes = hw_padded * itemsize
    rows_per_buf = per_buf // max(row_bytes, 1)

    if rows_per_buf >= rows:
        # Whole tensor fits in a single buffer.  Still split into >= 2 blocks
        # so the pipeline has something to overlap and v7x megacore can shard.
        if rows >= 2 * sub:
            return min(rows, _round_up(pl.cdiv(rows, 2), sub)), hw_padded
        if hw_padded >= 2 * _LANE:
            return rows, _round_up(pl.cdiv(hw_padded, 2), _LANE)
        return rows, hw_padded

    if rows_per_buf >= sub:
        # Tile rows, keep the full lane extent: each block is one fully
        # contiguous HBM region (best DMA efficiency).
        return (rows_per_buf // sub) * sub, hw_padded

    # hw is so large that even `sub` full rows overflow the budget: keep a
    # bounded number of rows on sublanes and tile the lane axis.
    block_rows = rows
    if rows * _LANE * itemsize > per_buf and rows > sub:
        block_rows = max((per_buf // (_LANE * itemsize)) // sub * sub, sub)
    tile_hw = max((per_buf // max(block_rows * itemsize, 1)) // _LANE * _LANE,
                  _LANE)
    return block_rows, min(tile_hw, hw_padded)


def scaling_layer(x: jax.Array, *, donate: bool = False) -> jax.Array:
    """Applies (x - shift) / scale with LPIPS constants. x is NCHW, C == 3."""
    N, C, H, W = x.shape
    assert C == 3, "ScalingLayer expects 3 channels"

    rows = N * C
    hw = H * W
    itemsize = jnp.dtype(x.dtype).itemsize

    x2d = x.reshape(rows, hw)

    # Keep the lane axis a multiple of 128 so every path gets a real grid
    # (padding is cheap relative to the degenerate single-block fallback).
    hw_padded = _round_up(hw, _LANE)
    if hw_padded != hw:
        x2d = jnp.pad(x2d, ((0, 0), (0, hw_padded - hw)))

    per_buf, vmem_limit = _budgets()
    block_rows, tile_hw = _choose_tiles(rows, hw_padded, itemsize, per_buf)

    grid = (pl.cdiv(rows, block_rows), pl.cdiv(hw_padded, tile_hw))
    in_spec = pl.BlockSpec((block_rows, tile_hw), lambda r, c: (r, c))
    out_spec = pl.BlockSpec((block_rows, tile_hw), lambda r, c: (r, c))

    out2d = pl.pallas_call(
        _scaling_kernel,
        out_shape=jax.ShapeDtypeStruct((rows, hw_padded), x.dtype),
        grid_spec=pltpu.PrefetchScalarGridSpec(
            num_scalar_prefetch=0,
            grid=grid,
            in_specs=[in_spec],
            out_specs=out_spec,
        ),
        compiler_params=pltpu.CompilerParams(
            dimension_semantics=("parallel", "parallel"),
            vmem_limit_bytes=vmem_limit,
        ),
        cost_estimate=pl.CostEstimate(
            flops=2 * rows * hw_padded,
            transcendentals=0,
            bytes_accessed=2 * rows * hw_padded * itemsize,
        ),
        input_output_aliases=({0: 0} if donate else {}),
    )(x2d)

    if hw_padded != hw:
        out2d = out2d[:, :hw]
    return out2d.reshape(N, C, H, W)


if __name__ == "__main__":
    key = jax.random.PRNGKey(0)

    shift = jnp.array(_SHIFT, jnp.float32).reshape(1, 3, 1, 1)
    scale = jnp.array(_SCALE, jnp.float32).reshape(1, 3, 1, 1)

    # Shapes exercising: small multi-block split, lane-split pipelined path,
    # the lane-padding path (H*W not a multiple of 128), and row-blocking
    # where the block size is not a multiple of 3 (global-row channel logic,
    # including a partial edge row block).
    shapes = [(2, 3, 16, 16), (2, 3, 128, 128), (2, 3, 10, 10), (10, 3, 16, 16)]
    for i, shape in enumerate(shapes):
        x = jax.random.normal(jax.random.fold_in(key, i), shape, dtype=jnp.float32)
        out = jax.block_until_ready(scaling_layer(x))
        ref = (x - shift) / scale
        # multiply-by-reciprocal differs from true divide by ~1 ulp.
        assert jnp.allclose(out, ref, atol=1e-5, rtol=1e-5), f"mismatch for {shape}"

    print("KERNEL_OK")
</pallas_src>

<mosaic_0001>
module attributes {stable_mosaic.version = 11 : i64} {
  func.func @_scaling_kernel(%arg0: i32, %arg1: i32, %arg2: memref<6x128xf32, #tpu.memory_space<vmem>>, %arg3: memref<6x128xf32, #tpu.memory_space<vmem>>) attributes {dimension_semantics = [#tpu.dimension_semantics<parallel>, #tpu.dimension_semantics<parallel>], iteration_bounds = array<i64: 1, 2>, scalar_prefetch = 0 : i64, scratch_operands = 0 : i64, tpu.core_type = #tpu.core_type<tc>, window_params = [{transform_indices = @transform_0, window_bounds = array<i64: 6, 128>}, {transform_indices = @transform_1, window_bounds = array<i64: 6, 128>}]} {
    %c6_i32 = arith.constant 6 : i32
    %0 = arith.muli %arg0, %c6_i32 : i32
    %1 = tpu.iota {dimensions = array<i32: 0>} : vector<6x1xi32>
    %2 = vector.broadcast %0 : i32 to vector<6x1xi32>
    %3 = arith.addi %2, %1 : vector<6x1xi32>
    %c3_i32 = arith.constant 3 : i32
    %c0_i32 = arith.constant 0 : i32
    %4 = arith.cmpi eq, %c3_i32, %c0_i32 : i32
    %c1_i32 = arith.constant 1 : i32
    %5 = arith.select %4, %c1_i32, %c3_i32 : i32
    %6 = vector.broadcast %5 : i32 to vector<6x1xi32>
    %7 = arith.remsi %3, %6 : vector<6x1xi32>
    %c0_i32_0 = arith.constant 0 : i32
    %8 = vector.broadcast %c0_i32_0 : i32 to vector<6x1xi32>
    %9 = arith.cmpi ne, %7, %8 : vector<6x1xi32>
    %c0_i32_1 = arith.constant 0 : i32
    %10 = vector.broadcast %c0_i32_1 : i32 to vector<6x1xi32>
    %11 = arith.cmpi slt, %7, %10 : vector<6x1xi32>
    %c0_i32_2 = arith.constant 0 : i32
    %12 = arith.cmpi slt, %5, %c0_i32_2 : i32
    %13 = vector.broadcast %12 : i1 to vector<6x1xi1>
    %14 = vector.broadcast %13 : vector<6x1xi1> to vector<6x1xi1>
    %15 = arith.xori %11, %14 : vector<6x1xi1>
    %16 = arith.andi %15, %9 : vector<6x1xi1>
    %17 = vector.broadcast %5 : i32 to vector<6x1xi32>
    %18 = arith.addi %7, %17 : vector<6x1xi32>
    %19 = arith.select %16, %18, %7 : vector<6x1xi1>, vector<6x1xi32>
    %c0_i32_3 = arith.constant 0 : i32
    %20 = vector.broadcast %c0_i32_3 : i32 to vector<6x1xi32>
    %21 = arith.cmpi eq, %19, %20 : vector<6x1xi32>
    %c1_i32_4 = arith.constant 1 : i32
    %22 = vector.broadcast %c1_i32_4 : i32 to vector<6x1xi32>
    %23 = arith.cmpi eq, %19, %22 : vector<6x1xi32>
    %cst = arith.constant -0.0879999995 : f32
    %cst_5 = arith.constant -1.880000e-01 : f32
    %24 = vector.broadcast %cst : f32 to vector<6x1xf32>
    %25 = vector.broadcast %cst_5 : f32 to vector<6x1xf32>
    %26 = arith.select %23, %24, %25 : vector<6x1xi1>, vector<6x1xf32>
    %cst_6 = arith.constant -3.000000e-02 : f32
    %27 = vector.broadcast %cst_6 : f32 to vector<6x1xf32>
    %28 = arith.select %21, %27, %26 : vector<6x1xi1>, vector<6x1xf32>
    %c0_i32_7 = arith.constant 0 : i32
    %29 = vector.broadcast %c0_i32_7 : i32 to vector<6x1xi32>
    %30 = arith.cmpi eq, %19, %29 : vector<6x1xi32>
    %c1_i32_8 = arith.constant 1 : i32
    %31 = vector.broadcast %c1_i32_8 : i32 to vector<6x1xi32>
    %32 = arith.cmpi eq, %19, %31 : vector<6x1xi32>
    %cst_9 = arith.constant 2.23214293 : f32
    %cst_10 = arith.constant 2.22222233 : f32
    %33 = vector.broadcast %cst_9 : f32 to vector<6x1xf32>
    %34 = vector.broadcast %cst_10 : f32 to vector<6x1xf32>
    %35 = arith.select %32, %33, %34 : vector<6x1xi1>, vector<6x1xf32>
    %cst_11 = arith.constant 2.18340611 : f32
    %36 = vector.broadcast %cst_11 : f32 to vector<6x1xf32>
    %37 = arith.select %30, %36, %35 : vector<6x1xi1>, vector<6x1xf32>
    %c0 = arith.constant 0 : index
    %c0_12 = arith.constant 0 : index
    %38 = vector.load %arg2[%c0, %c0_12] : memref<6x128xf32, #tpu.memory_space<vmem>>, vector<6x128xf32>
    %39 = vector.broadcast %28 : vector<6x1xf32> to vector<6x128xf32>
    %40 = arith.subf %38, %39 : vector<6x128xf32>
    %41 = vector.broadcast %37 : vector<6x1xf32> to vector<6x128xf32>
    %42 = arith.mulf %40, %41 : vector<6x128xf32>
    %c0_13 = arith.constant 0 : index
    %c0_14 = arith.constant 0 : index
    %43 = vector.load %arg3[%c0_13, %c0_14] : memref<6x128xf32, #tpu.memory_space<vmem>>, vector<6x128xf32>
    tpu.vector_store %arg3[%c0_13, %c0_14], %42 {strides = array<i32>} : memref<6x128xf32, #tpu.memory_space<vmem>>, vector<6x128xf32>,
    return
  }
  func.func @transform_0(%arg0: i32, %arg1: i32) -> (i32, i32) {
    %c0_i32 = arith.constant 0 : i32
    return %arg0, %arg1 : i32, i32
  }
  func.func @transform_1(%arg0: i32, %arg1: i32) -> (i32, i32) {
    %c0_i32 = arith.constant 0 : i32
    return %arg0, %arg1 : i32, i32
  }
}

</mosaic_0001>

<bundles_post_ra>
// kernel: tpu_custom_call.1
= control target key start
LH: loop header
LB: loop body
LE: loop exit
PB: predicated region body
PF: predicated region fallthrough
CT: control target
= control target key end

     0   :  { %6 = vsyncpa [#allocation3], 0  ;;  %s633_s0 = inlined_call_operand.hbm [shape: f32[6,256], index: 0, kind: input, shape index: {}]   ;;  %s634_s1 = inlined_call_operand.hbm [shape: f32[6,256], index: 1, kind: output, shape index: {}]  }
   0x1   :  { %8 = vsyncpa [#allocation3 + $0x1], 0 }
   0x2   :  { %9 = vsyncpa [#allocation4], 0 }
   0x3   :  { %11 = vsyncpa [#allocation4 + $0x1], 0  ;;  %s506_s6 = smov 0   ;;  %s508_s7 = smov 0  }
   0x4   :  { %s510_s8 = smov 0   ;;  %s512_s9 = smov 0  }
   0x5   :  { %s514_s10 = smov 0   ;;  %s516_s11 = smov 0  }
   0x6 LB: > { %s301_s12 = sadd.s32 4294967295, %s491_s11   ;;  %s302_s13 = sadd.s32 4294967294, %s491_s11   ;;  %s491_s11 = sphi %s516_s11, %s17_s11   ;;  %s487_s10 = sphi %s514_s10, %s643_s10   ;;  %s483_s9 = sphi %s512_s9, %s642_s9   ;;  %s479_s8 = sphi %s510_s8, %s641_s8   ;;  %s475_s7 = sphi %s508_s7, %s640_s7   ;;  %s471_s6 = sphi %s506_s6, %s639_s6  }
   0x7   : > { %s26_s14 = sadd.s32 1, %s487_s10  ;;  %s38_s15 = sadd.s32 1, %s479_s8 }
   0x8   : > { %p27_p0 = scmp.ge.s32.totalorder %s26_s14, 2  ;;  %p45_p1 = scmp.ne.s32.totalorder %s479_s8, %s475_s7 }
   0x9   : > { %p46_p2 = scmp.eq.s32.totalorder %s491_s11, 0  ;;  %p51_p3 = scmp.ne.s32.totalorder %s475_s7, %s471_s6 }
   0xa   : > { %s645_s14 = smov (%p27_p0, %s26_s14), 0  ;;  %p52_p5 = scmp.eq.s32.totalorder %s301_s12, 0 }
   0xb   : > { %p547_p4 = por %p46_p2, %p45_p1  ;;  %s34_s17 = ssub.s32 %s487_s10, %s645_s14 }
   0xc   : > { %p77_p6 = scmp.eq.s32.totalorder %s301_s12, 1  ;;  %p36_p7 = scmp.eq.s32.totalorder %s34_s17, 0 }
   0xd   : > { %p553_p8 = por %p52_p5, %p51_p3  ;;  %p83_p10 = scmp.eq.s32.totalorder %s302_s13, 1 }
   0xe   : > { %p557_p9 = por %p77_p6, %p45_p1  ;;  %p304_p12 = scmp.ge.s32.totalorder %s491_s11, 2 }
   0xf   : > { %s562_s20 = scalar_select %p36_p7, %s479_s8, %s38_s15  }
  0x10   : > { %p564_p11 = por %p83_p10, %p51_p3  ;;  %p326_p13 = scmp.lt.s32.totalorder %s491_s11, 2 }
  0x11   : > { %s103_s22 = sand.u32 1, %s479_s8   ;;  %s306_s24 = sshll.u32 %s487_s10, 3 }
  0x12   : > { %s305_s23 = sshll.u32 %s103_s22, 3  ;;  %s113_s27 = scalar_lea.hbm %s633_s0, %s306_s24 }
  0x13   : > { %s107_s28 = scalar_lea.vmem [#allocation2], %s305_s23  ;;  %s115_s30 = sshll.u32 %s113_s27, 4  ;;  %s116_s30 = int_to_ptr.hbm [resolvable:$true] %s115_s30 }
  0x14   : > { %s117_s29 = sshll.u32 %s107_s28, 4  ;;  %p319_p0 = pnand %p326_p13, %p547_p4  ;;  %s118_s29 = int_to_ptr.vmem [resolvable:$true] %s117_s29 }
  0x15   : > { %p307_p1 = scmp.ge.s32.totalorder %s491_s11, 1  ;;  %p122_p2 = scmp.lt.s32.totalorder %s491_s11, 3 }
  0x16   : > { %s104_s2 = scalar_lea.sflag [#allocation3], %s103_s22 }
  0x17   : > { %321 = dma.hbm_to_vmem [thread:$0]  (!%p319_p0), %s116_s30, 128, %s118_s29, %s104_s2  }
  0x18   : > { %p123_p3 = pnand %p307_p1, %p122_p2 }
  0x19   : > { %s580_s3 = sand.u32 (!%p123_p3), 1, %s475_s7  }
  0x1a   : > { %126 = sbr.rel (%p123_p3) target bundleno = 71 (0x47), region = 24  ;;  %s308_s4 = sshll.u32 (!%p123_p3), %s580_s3, 3 }
  0x1b   : > { %s129_s5 = scalar_lea.sflag (!%p123_p3), [#allocation3], %s580_s3  ;;  %s586_s12 = scalar_lea.vmem (!%p123_p3), [#allocation2], %s308_s4 }
  0x1f   : > { %462 = dma.done.wait (%p553_p8), %s129_s5, 128  }
  0x20   : > { %464 = vsyncadd (%p553_p8), %s129_s5, 4294967168  ;;  %v153_v0 = vlaneseq  ;;  %v493_v11 = vmov 0   ;;  %s311_s13 = sshll.u32 %s483_s9, 3  ;;  %v197_v25 = vld [vmem:[%s586_s12] sm:$0x3f]  ;;  %s151_s9 = scalar_lea.vmem [#allocation5], %s308_s4 }
  0x21   : > { %s214_s17 = scalar_lea.hbm %s634_s1, %s311_s13  ;;  %v494_v26 = vmov -0.188   ;;  %v495_v28 = vmov 2.2222223   ;;  %s216_s18 = sshll.u32 %s151_s9, 4  ;;  %s217_s18 = int_to_ptr.vmem [resolvable:$true] %s216_s18 }
  0x22   : > { %v154_v1 = vshrl.u32 %v153_v0, 7  ;;  %s218_s22 = sshll.u32 %s214_s17, 4  ;;  %s202_s23 = scalar_lea.sflag [#allocation4], %s580_s3  ;;  %s219_s22 = int_to_ptr.hbm [resolvable:$true] %s218_s22 }
  0x23   : > { %s423_s24 = sshra.s32 %s219_s22, 4  ;;  %s429_s28 = scalar_lea.hbm %s634_s1, 16  ;;  %s424_s24 = int_to_ptr.hbm [resolvable:$true] %s423_s24 }
  0x24   : > { %v160_v2 = vand.u32 65535, %v154_v1  ;;  %v161_v3 = vshrl.u32 %v154_v1, 16  ;;  %s425_s25 = scalar_lea.hbm %s424_s24, 8  ;;  %p430_p7 = scmp.lt.s32.totalorder %s424_s24, %s634_s1 }
  0x25   : > { %p426_p4 = scmp.ne.s32.totalorder %s424_s24, %s425_s25  ;;  %p431_p8 = scmp.lt.s32.totalorder %s429_s28, %s425_s25 }
  0x26   : > { %v163_v4 = vmul.u32 43691, %v160_v2  ;;  %v164_v5 = vmul.u32 43690, %v160_v2  ;;  %v165_v6 = vmul.u32 43691, %v161_v3  ;;  %v166_v7 = vmul.u32 43690, %v161_v3 }
  0x27   : > { %p427_p5 = pnand %p426_p4, %p557_p9  ;;  %p432_p10 = por %p431_p8, %p430_p7 }
  0x28   : > { %v167_v8 = vshll.u32 %v164_v5, 16  ;;  %v169_v9 = vshll.u32 %v165_v6, 16  ;;  %v168_v13 = vshrl.u32 %v164_v5, 16  ;;  %v170_v16 = vshrl.u32 %v165_v6, 16 }
  0x29   : > { %p428_p6 = pneg %p427_p5 }
  0x2a   : > { %vm171_vm0 = vc.u32 %v163_v4, %v167_v8  ;;  %v173_v10 = vadd.s32 %v167_v8, %v163_v4 }
  0x2b   : > { %v172_v12 = vsel %vm171_vm0, 1, %v493_v11  ;;  %p433_p13 = pnand %p432_p10, %p428_p6 }
  0x2c   : > { %v174_v14 = vadd.s32 %v172_v12, %v166_v7  ;;  %vm175_vm1 = vc.u32 %v173_v10, %v169_v9 }
  0x2d   : > { %v176_v15 = vsel %vm175_vm1, 1, %v493_v11 }
  0x2e   : > { %v178_v17 = vadd.s32 %v176_v15, %v174_v14 }
  0x30   : > { %v179_v18 = vadd.s32 %v178_v17, %v168_v13 }
  0x32   : > { %v180_v19 = vadd.s32 %v179_v18, %v170_v16 }
  0x34   : > { %v181_v20 = vshrl.u32 %v180_v19, 1 }
  0x36   : > { %v182_v21 = vmul.u32 3, %v181_v20 }
  0x38   : > { %v183_v22 = vsub.s32 %v154_v1, %v182_v21 }
  0x3a   : > { %vm186_vm2 = vcmp.ne.s32.totalorder %v183_v22, 0  ;;  %vm187_vm3 = vcmp.lt.s32.totalorder %v183_v22, 0  ;;  %v189_v23 = vadd.s32 3, %v183_v22 }
  0x3b   : > { %vm188_vm4 = vmand %vm187_vm3, %vm186_vm2 }
  0x3c   : > { %v190_v24 = vsel %vm188_vm4, %v189_v23, %v183_v22 }
  0x3d   : > { %vm191_vm5 = vcmp.eq.s32.totalorder %v190_v24, 0  ;;  %vm192_vm6 = vcmp.eq.s32.totalorder %v190_v24, 1 }
  0x3e   : > { %v193_v27 = vsel %vm192_vm6, -0.088, %v494_v26  ;;  %v195_v29 = vsel %vm192_vm6, 2.232143, %v495_v28 }
  0x3f   : > { %v194_v30 = vsel %vm191_vm5, -0.03, %v193_v27  ;;  %v196_v31 = vsel %vm191_vm5, 2.183406, %v195_v29 }
  0x40   : > { %v198_v32 = vsub.f32 %v197_v25, %v194_v30 }
  0x42   : > { %v199_v33 = vmul.f32 %v198_v32, %v196_v31 }
  0x44   : > { %200 = vst [vmem:[%s151_s9] sm:$0x3f] %v199_v33 }
  0x45   : > { %436 = shalt.err (!%p433_p13)
}
  0x46   : > { %316 = dma.vmem_to_hbm [thread:$0]  (%p557_p9), %s217_s18, 128, %s219_s22, %s202_s23  }
  0x47 PF: > { %s230_s2 = sand.u32 1, %s471_s6   ;;  %p323_p0 = pnand %p304_p12, %p564_p11 }
  0x48   : > { %s231_s3 = scalar_lea.sflag [#allocation4], %s230_s2 }
  0x49   : > { %p324_p1 = pneg %p323_p0 }
  0x4b   : > { %466 = dma.done.wait (%p324_p1), %s231_s3, 128  }
  0x4c   : > { %468 = vsyncadd (%p324_p1), %s231_s3, 4294967168  ;;  %s17_s11 = sadd.s32 1, %s491_s11   ;;  %s639_s6 = smov %s475_s7 }
  0x4d   : > { %p14_p2 = scmp.ge.s32.totalorder %s17_s11, 4   ;;  %s640_s7 = smov %s479_s8 }
  0x4e   : > { %s641_s8 = smov %s562_s20  ;;  %s642_s9 = smov %s487_s10 }
  0x4f   : > { %s643_s10 = smov %s645_s14  ;;  %16 = sbr.rel (!%p14_p2) target bundleno = 6 (0x6), region = 69 }
  0x54   :  { %237 = vsyncpa [#allocation3], 1 }
  0x55   :  { %239 = vsyncpa [#allocation3 + $0x1], 1 }
  0x56   :  { %240 = vsyncpa [#allocation4], 1 }
  0x57   :  { %242 = vsyncpa [#allocation4 + $0x1], 1 }

</bundles_post_ra>
